<compile_context>
chip_gen: v7x
topology: tpu7x:2x2x1
jax: 0.10.0
libtpu: 0.0.40
codegen_flags: <defaults>
</compile_context>

<pallas_src>
import functools

import jax
import jax.numpy as jnp
from jax.experimental import pallas as pl
from jax.experimental.pallas import tpu as pltpu

EPS = 1e-9  # module uses self.eps = 1e-09


# --------------------- Kernel 1: literal forward() = strided Conv1d ---------------------- #
def _strided_conv1d_kernel(x_ref, w_ref, b_ref, o_ref, *, k, l_out):
    """out[o, l] = bias[o] + sum_{c,t} w[o,c,t] * x[c, l*k + t]   (stride=k, padding=0)."""
    x = x_ref[0].astype(jnp.float32)                 # (C_in, L)
    l = x.shape[1]
    c_out = o_ref.shape[1]

    # 0/1 gather matrices G_t[p, l] = (p == l*k + t), so x @ G_t == x[:, t::k][:, :l_out].
    # The strided window extraction runs on the (otherwise idle) MXU: no im2col / unfold
    # intermediate is ever materialized in HBM or VMEM.
    rows = jax.lax.broadcasted_iota(jnp.int32, (l, l_out), 0)
    cols = jax.lax.broadcasted_iota(jnp.int32, (l, l_out), 1)

    acc = jnp.zeros((c_out, l_out), jnp.float32)
    for t in range(k):                               # k is small and static -> unrolled
        g_t = (rows == cols * k + t).astype(jnp.float32)             # (L, L_out)
        x_t = jnp.dot(x, g_t, preferred_element_type=jnp.float32)    # (C_in, L_out)
        acc = acc + jnp.dot(w_ref[t].astype(jnp.float32), x_t,
                            preferred_element_type=jnp.float32)      # (C_out, L_out)
    o_ref[0] = (acc + b_ref[...].astype(jnp.float32)).astype(o_ref.dtype)


def conv1d_mag_forward(x, weight, bias, kernel_size):
    """Conv1dMag.forward(x): x (B, C_in, L) -> (B, C_out, (L-K)//K + 1)."""
    b, c_in, l = x.shape
    k = kernel_size
    c_out = weight.shape[0]
    assert weight.shape == (c_out, c_in, k) and bias.shape == (c_out,)
    assert l >= k
    l_out = (l - k) // k + 1

    w_taps = jnp.transpose(weight, (2, 0, 1))        # (K, C_out, C_in): tap on leading dim
    b_col = bias.reshape(c_out, 1)

    kern = functools.partial(_strided_conv1d_kernel, k=k, l_out=l_out)
    return pl.pallas_call(
        kern,
        out_shape=jax.ShapeDtypeStruct((b, c_out, l_out), x.dtype),
        grid=(b,),
        in_specs=[
            pl.BlockSpec((1, c_in, l), lambda i: (i, 0, 0)),
            pl.BlockSpec((k, c_out, c_in), lambda i: (0, 0, 0)),
            pl.BlockSpec((c_out, 1), lambda i: (0, 0)),
        ],
        out_specs=pl.BlockSpec((1, c_out, l_out), lambda i: (i, 0, 0)),
        compiler_params=pltpu.CompilerParams(dimension_semantics=("parallel",)),
    )(x, w_taps, b_col)


# ------ Kernel 2: fused unfold -> transform -> conv1d -> inverse_transform (helper path) ------ #
def _mag_equivariant_kernel(x_ref, w_ref, b_ref, o_ref, *, k, pad, eps):
    """out[o,s] = ( bias[o] + sum_{c,t} w[o,c,t] * u[c,t,s]/(scaler[s]+eps) ) * (scaler[s]+eps)
    with u[c,t,s] = x[c, (s+t-pad) mod S] (circular pad) and scaler = max_{c,t} u - min_{c,t} u."""
    x = x_ref[0].astype(jnp.float32)                 # (C_in, S), stats in f32 (v5e-safe)
    s = x.shape[1]
    c_out = o_ref.shape[1]

    # Channel-first separable max/min: reduce over C once, then k-1 shifted maxes on 1xS rows.
    cmax = jnp.max(x, axis=0, keepdims=True)         # (1, S)
    cmin = jnp.min(x, axis=0, keepdims=True)
    wmax, wmin = cmax, cmin

    acc = jnp.zeros((c_out, s), jnp.float32)
    for t in range(k):
        shift = pad - t                              # circular window t == roll by (pad - t)
        if shift == 0:
            u_t = x
        else:
            # static-shift roll lowers to in-register slices+concat (pltpu.roll / XLU would
            # also work on hardware); circular padding_mode is reproduced exactly.
            u_t = jnp.roll(x, shift, axis=1)
            wmax = jnp.maximum(wmax, jnp.roll(cmax, shift, axis=1))
            wmin = jnp.minimum(wmin, jnp.roll(cmin, shift, axis=1))
        # each shifted window is consumed immediately (never materialized in HBM)
        acc = acc + jnp.dot(w_ref[t].astype(jnp.float32), u_t,
                            preferred_element_type=jnp.float32)      # (C_out, S)

    den = (wmax - wmin) + eps                        # scaler + eps, (1, S)
    inv = 1.0 / den                                  # single reciprocal, reused below
    y = acc * inv + b_ref[...].astype(jnp.float32)   # conv1d on max-min normalized windows
    o_ref[0] = (y * den).astype(o_ref.dtype)         # inverse_transform


def conv1d_mag_equivariant_forward(x, weight, bias, kernel_size, eps=EPS):
    """unfold -> transform -> conv1d(stride=K) -> inverse_transform, fused in one kernel."""
    b, c_in, s = x.shape
    k = kernel_size
    c_out = weight.shape[0]
    assert weight.shape == (c_out, c_in, k) and bias.shape == (c_out,)
    assert k % 2 == 1, "module's unfold() only keeps length for odd kernel_size"
    pad = (k - 1) // 2

    w_taps = jnp.transpose(weight, (2, 0, 1))        # (K, C_out, C_in)
    b_col = bias.reshape(c_out, 1)

    kern = functools.partial(_mag_equivariant_kernel, k=k, pad=pad, eps=eps)
    return pl.pallas_call(
        kern,
        out_shape=jax.ShapeDtypeStruct((b, c_out, s), x.dtype),
        grid=(b,),
        in_specs=[
            pl.BlockSpec((1, c_in, s), lambda i: (i, 0, 0)),
            pl.BlockSpec((k, c_out, c_in), lambda i: (0, 0, 0)),
            pl.BlockSpec((c_out, 1), lambda i: (0, 0)),
        ],
        out_specs=pl.BlockSpec((1, c_out, s), lambda i: (i, 0, 0)),
        compiler_params=pltpu.CompilerParams(dimension_semantics=("parallel",)),
    )(x, w_taps, b_col)


# ------------------------------ Pure-JAX references ------------------------------ #
_HI = jax.lax.Precision.HIGHEST


def reference_forward(x, weight, bias, kernel_size):
    """nn.Conv1d(C_in, C_out, K, stride=K, padding=0, bias=True) == module.forward."""
    b, c_in, l = x.shape
    k = kernel_size
    l_out = (l - k) // k + 1
    xw = x[:, :, :l_out * k].reshape(b, c_in, l_out, k)           # xw[b,c,l,t] = x[b,c,l*k+t]
    return jnp.einsum("bclt,oct->bol", xw, weight, precision=_HI) + bias[None, :, None]


def reference_equivariant(x, weight, bias, kernel_size, eps=EPS):
    """Literal unfold/transform/conv1d/inverse_transform sequence of the module."""
    b, c_in, s = x.shape
    k = kernel_size
    p = (k - 1) // 2
    xp = jnp.concatenate([x[:, :, s - p:], x, x[:, :, :p]], axis=2) if p > 0 else x  # circular
    u = jnp.stack([xp[:, :, t:t + s] for t in range(k)], axis=2)                     # (B,C,K,S)
    scaler = (u.max(axis=1, keepdims=True).max(axis=2, keepdims=True)
              - u.min(axis=1, keepdims=True).min(axis=2, keepdims=True))             # (B,1,1,S)
    n = u / (scaler + eps)
    # conv1d(stride=k) on n permuted/reshaped to (B, C, S*K): contraction over (c, t)
    y = jnp.einsum("bcts,oct->bos", n, weight, precision=_HI) + bias[None, :, None]
    return y * (scaler[:, :, 0] + eps)                                               # inverse


if __name__ == "__main__":
    B, C_IN, C_OUT, K, L = 2, 4, 4, 3, 16
    key = jax.random.PRNGKey(0)
    kx, kw, kb = jax.random.split(key, 3)

    # Snap test data to bf16-representable f32 values so MXU bf16-pass matmuls and the
    # full-precision XLA reference agree to ~f32 rounding (keeps tolerances tight).
    def _snap(a):
        return a.astype(jnp.bfloat16).astype(jnp.float32)

    x = _snap(jax.random.normal(kx, (B, C_IN, L), dtype=jnp.float32))
    conv_weight = _snap(jax.random.normal(kw, (C_OUT, C_IN, K), dtype=jnp.float32) * 0.1)
    conv_bias = _snap(jax.random.normal(kb, (C_OUT,), dtype=jnp.float32) * 0.1)

    # 1) literal forward(): a single fused strided-conv kernel
    out = jax.block_until_ready(conv1d_mag_forward(x, conv_weight, conv_bias, K))
    ref = reference_forward(x, conv_weight, conv_bias, K)
    assert out.shape == (B, C_OUT, (L - K) // K + 1), out.shape
    assert jnp.allclose(out, ref, atol=1e-4, rtol=1e-4), "forward (conv1d) mismatch"

    # 2) the module's magnitude-equivariant helper path, fused into one kernel
    out_eq = jax.block_until_ready(conv1d_mag_equivariant_forward(x, conv_weight, conv_bias, K))
    ref_eq = reference_equivariant(x, conv_weight, conv_bias, K)
    assert out_eq.shape == (B, C_OUT, L), out_eq.shape
    assert jnp.allclose(out_eq, ref_eq, atol=1e-4, rtol=1e-4), "equivariant path mismatch"

    print("KERNEL_OK")
</pallas_src>

<mosaic_0001>
module attributes {stable_mosaic.version = 11 : i64} {
  func.func @_strided_conv1d_kernel(%arg0: i32, %arg1: memref<1x4x16xf32, #tpu.memory_space<vmem>>, %arg2: memref<3x4x4xf32, #tpu.memory_space<vmem>>, %arg3: memref<4x1xf32, #tpu.memory_space<vmem>>, %arg4: memref<1x4x5xf32, #tpu.memory_space<vmem>>) attributes {dimension_semantics = [#tpu.dimension_semantics<parallel>], iteration_bounds = array<i64: 2>, scalar_prefetch = 0 : i64, scratch_operands = 0 : i64, tpu.core_type = #tpu.core_type<tc>, window_params = [{transform_indices = @transform_0, window_bounds = array<i64: 1, 4, 16>}, {pipeline_mode = #tpu.pipeline_mode<synchronous>, transform_indices = @transform_1, window_bounds = array<i64: 3, 4, 4>}, {pipeline_mode = #tpu.pipeline_mode<synchronous>, transform_indices = @transform_2, window_bounds = array<i64: 4, 1>}, {transform_indices = @transform_3, window_bounds = array<i64: 1, 4, 5>}]} {
    %c0 = arith.constant 0 : index
    %c0_0 = arith.constant 0 : index
    %c0_1 = arith.constant 0 : index
    %0 = vector.load %arg1[%c0, %c0_0, %c0_1] : memref<1x4x16xf32, #tpu.memory_space<vmem>>, vector<1x4x16xf32>
    %1 = vector.shape_cast %0 : vector<1x4x16xf32> to vector<4x16xf32>
    %2 = tpu.iota {dimensions = array<i32: 0>} : vector<16x5xi32>
    %3 = tpu.iota {dimensions = array<i32: 1>} : vector<16x5xi32>
    %cst = arith.constant 0.000000e+00 : f32
    %4 = vector.broadcast %cst : f32 to vector<4x5xf32>
    %c3_i32 = arith.constant 3 : i32
    %5 = vector.broadcast %c3_i32 : i32 to vector<16x5xi32>
    %6 = arith.muli %3, %5 : vector<16x5xi32>
    %c0_i32 = arith.constant 0 : i32
    %7 = vector.broadcast %c0_i32 : i32 to vector<16x5xi32>
    %8 = arith.addi %6, %7 : vector<16x5xi32>
    %9 = arith.cmpi eq, %2, %8 : vector<16x5xi32>
    %10 = arith.extui %9 : vector<16x5xi1> to vector<16x5xi32>
    %11 = arith.sitofp %10 : vector<16x5xi32> to vector<16x5xf32>
    %cst_2 = arith.constant dense<0.000000e+00> : vector<4x5xf32>
    %12 = tpu.matmul %1, %11, %cst_2 {dimension_numbers = #tpu.dot_dimension_numbers<[1], [0], [0], [1], [0, 0, 1, 1], [], []>} : vector<4x16xf32>, vector<16x5xf32>, vector<4x5xf32> -> vector<4x5xf32>
    %c0_3 = arith.constant 0 : index
    %c0_4 = arith.constant 0 : index
    %c0_5 = arith.constant 0 : index
    %13 = vector.load %arg2[%c0_3, %c0_4, %c0_5] : memref<3x4x4xf32, #tpu.memory_space<vmem>>, vector<1x4x4xf32>
    %14 = vector.shape_cast %13 : vector<1x4x4xf32> to vector<4x4xf32>
    %cst_6 = arith.constant dense<0.000000e+00> : vector<4x5xf32>
    %15 = tpu.matmul %14, %12, %cst_6 {dimension_numbers = #tpu.dot_dimension_numbers<[1], [0], [0], [1], [0, 0, 1, 1], [], []>} : vector<4x4xf32>, vector<4x5xf32>, vector<4x5xf32> -> vector<4x5xf32>
    %16 = arith.addf %4, %15 : vector<4x5xf32>
    %c3_i32_7 = arith.constant 3 : i32
    %17 = vector.broadcast %c3_i32_7 : i32 to vector<16x5xi32>
    %18 = arith.muli %3, %17 : vector<16x5xi32>
    %c1_i32 = arith.constant 1 : i32
    %19 = vector.broadcast %c1_i32 : i32 to vector<16x5xi32>
    %20 = arith.addi %18, %19 : vector<16x5xi32>
    %21 = arith.cmpi eq, %2, %20 : vector<16x5xi32>
    %22 = arith.extui %21 : vector<16x5xi1> to vector<16x5xi32>
    %23 = arith.sitofp %22 : vector<16x5xi32> to vector<16x5xf32>
    %cst_8 = arith.constant dense<0.000000e+00> : vector<4x5xf32>
    %24 = tpu.matmul %1, %23, %cst_8 {dimension_numbers = #tpu.dot_dimension_numbers<[1], [0], [0], [1], [0, 0, 1, 1], [], []>} : vector<4x16xf32>, vector<16x5xf32>, vector<4x5xf32> -> vector<4x5xf32>
    %c1 = arith.constant 1 : index
    %c0_9 = arith.constant 0 : index
    %c0_10 = arith.constant 0 : index
    %25 = vector.load %arg2[%c1, %c0_9, %c0_10] : memref<3x4x4xf32, #tpu.memory_space<vmem>>, vector<1x4x4xf32>
    %26 = vector.shape_cast %25 : vector<1x4x4xf32> to vector<4x4xf32>
    %cst_11 = arith.constant dense<0.000000e+00> : vector<4x5xf32>
    %27 = tpu.matmul %26, %24, %cst_11 {dimension_numbers = #tpu.dot_dimension_numbers<[1], [0], [0], [1], [0, 0, 1, 1], [], []>} : vector<4x4xf32>, vector<4x5xf32>, vector<4x5xf32> -> vector<4x5xf32>
    %28 = arith.addf %16, %27 : vector<4x5xf32>
    %c3_i32_12 = arith.constant 3 : i32
    %29 = vector.broadcast %c3_i32_12 : i32 to vector<16x5xi32>
    %30 = arith.muli %3, %29 : vector<16x5xi32>
    %c2_i32 = arith.constant 2 : i32
    %31 = vector.broadcast %c2_i32 : i32 to vector<16x5xi32>
    %32 = arith.addi %30, %31 : vector<16x5xi32>
    %33 = arith.cmpi eq, %2, %32 : vector<16x5xi32>
    %34 = arith.extui %33 : vector<16x5xi1> to vector<16x5xi32>
    %35 = arith.sitofp %34 : vector<16x5xi32> to vector<16x5xf32>
    %cst_13 = arith.constant dense<0.000000e+00> : vector<4x5xf32>
    %36 = tpu.matmul %1, %35, %cst_13 {dimension_numbers = #tpu.dot_dimension_numbers<[1], [0], [0], [1], [0, 0, 1, 1], [], []>} : vector<4x16xf32>, vector<16x5xf32>, vector<4x5xf32> -> vector<4x5xf32>
    %c2 = arith.constant 2 : index
    %c0_14 = arith.constant 0 : index
    %c0_15 = arith.constant 0 : index
    %37 = vector.load %arg2[%c2, %c0_14, %c0_15] : memref<3x4x4xf32, #tpu.memory_space<vmem>>, vector<1x4x4xf32>
    %38 = vector.shape_cast %37 : vector<1x4x4xf32> to vector<4x4xf32>
    %cst_16 = arith.constant dense<0.000000e+00> : vector<4x5xf32>
    %39 = tpu.matmul %38, %36, %cst_16 {dimension_numbers = #tpu.dot_dimension_numbers<[1], [0], [0], [1], [0, 0, 1, 1], [], []>} : vector<4x4xf32>, vector<4x5xf32>, vector<4x5xf32> -> vector<4x5xf32>
    %40 = arith.addf %28, %39 : vector<4x5xf32>
    %c0_17 = arith.constant 0 : index
    %c0_18 = arith.constant 0 : index
    %41 = vector.load %arg3[%c0_17, %c0_18] : memref<4x1xf32, #tpu.memory_space<vmem>>, vector<4x1xf32>
    %42 = vector.broadcast %41 : vector<4x1xf32> to vector<4x5xf32>
    %43 = arith.addf %40, %42 : vector<4x5xf32>
    %c0_19 = arith.constant 0 : index
    %c0_20 = arith.constant 0 : index
    %c0_21 = arith.constant 0 : index
    %44 = vector.load %arg4[%c0_19, %c0_20, %c0_21] : memref<1x4x5xf32, #tpu.memory_space<vmem>>, vector<1x4x5xf32>
    %45 = vector.shape_cast %44 : vector<1x4x5xf32> to vector<4x5xf32>
    %46 = vector.shape_cast %43 : vector<4x5xf32> to vector<1x4x5xf32>
    tpu.vector_store %arg4[%c0_19, %c0_20, %c0_21], %46 {strides = array<i32>} : memref<1x4x5xf32, #tpu.memory_space<vmem>>, vector<1x4x5xf32>,
    return
  }
  func.func @transform_0(%arg0: i32) -> (i32, i32, i32) {
    %c0_i32 = arith.constant 0 : i32
    %c0_i32_0 = arith.constant 0 : i32
    %c0_i32_1 = arith.constant 0 : i32
    return %arg0, %c0_i32, %c0_i32_0 : i32, i32, i32
  }
  func.func @transform_1(%arg0: i32) -> (i32, i32, i32) {
    %c0_i32 = arith.constant 0 : i32
    %c0_i32_0 = arith.constant 0 : i32
    %c0_i32_1 = arith.constant 0 : i32
    %c0_i32_2 = arith.constant 0 : i32
    return %c0_i32, %c0_i32_0, %c0_i32_1 : i32, i32, i32
  }
  func.func @transform_2(%arg0: i32) -> (i32, i32) {
    %c0_i32 = arith.constant 0 : i32
    %c0_i32_0 = arith.constant 0 : i32
    %c0_i32_1 = arith.constant 0 : i32
    return %c0_i32, %c0_i32_0 : i32, i32
  }
  func.func @transform_3(%arg0: i32) -> (i32, i32, i32) {
    %c0_i32 = arith.constant 0 : i32
    %c0_i32_0 = arith.constant 0 : i32
    %c0_i32_1 = arith.constant 0 : i32
    return %arg0, %c0_i32, %c0_i32_0 : i32, i32, i32
  }
}

</mosaic_0001>

<bundles_post_ra>
// kernel: tpu_custom_call.1
= control target key start
LH: loop header
LB: loop body
LE: loop exit
PB: predicated region body
PF: predicated region fallthrough
CT: control target
= control target key end

     0   :  { %8 = vsyncpa [#allocation3], 0  ;;  %s1319_s0 = inlined_call_operand.hbm [shape: f32[2,4,16], index: 0, kind: input, shape index: {}]   ;;  %s1320_s1 = inlined_call_operand.hbm [shape: f32[3,4,4], index: 1, kind: input, shape index: {}]   ;;  %s1321_s2 = inlined_call_operand.vmem [shape: f32[4,1], index: 2, kind: input, shape index: {}]   ;;  %s1322_s3 = inlined_call_operand.hbm [shape: f32[2,4,5], index: 3, kind: output, shape index: {}]  }
   0x1   :  { %10 = vsyncpa [#allocation3 + $0x1], 0 }
   0x2   :  { %11 = vsyncpa [#allocation6], 0 }
   0x3   :  { %12 = vsyncpa [#allocation4], 0 }
   0x4   :  { %14 = vsyncpa [#allocation4 + $0x1], 0  ;;  %s1101_s12 = smov 0   ;;  %s1103_s13 = smov 0  }
   0x5   :  { %s1105_s14 = smov 0   ;;  %s1107_s15 = smov 0  }
   0x6 LB: > { %s1122_s16 = sadd.s32 4294967295, %s1069_s15   ;;  %s781_s17 = sadd.s32 4294967294, %s1069_s15   ;;  %s1069_s15 = sphi %s1107_s15, %s1342_s15   ;;  %s1065_s14 = sphi %s1105_s14, %s1341_s14   ;;  %s1061_s13 = sphi %s1103_s13, %s1340_s13   ;;  %s1057_s12 = sphi %s1101_s12, %s1339_s12  }
   0x7   : > { %p40_p0 = scmp.ne.s32.totalorder %s1061_s13, %s1057_s12  ;;  %p1323_p1 = scmp.eq.s32.totalorder %s1122_s16, 0 }
   0x8   : > { %p112_p3 = scmp.eq.s32.totalorder %s781_s17, 1  ;;  %p782_p5 = scmp.ge.s32.totalorder %s1069_s15, 1 }
   0x9   : > { %p1131_p4 = por %p1323_p1, %p40_p0  ;;  %p119_p7 = scmp.lt.s32.totalorder %s1069_s15, 3 }
   0xa   : > { %p1136_p6 = por %p112_p3, %p40_p0  ;;  %s1071_s21 = smov [#allocation5]  }
   0xb   : > { %s1326_s18 = scalar_select %p1131_p4, 1, 0 }
   0xc   : > { %s1327_s19 = scalar_select %p1136_p6, 1, 0 }
   0xd   : > { %p1141_p8 = pnand %p782_p5, %p119_p7  ;;  %s131_s22 = sshll.u32 %s1071_s21, 4  ;;  %s1145_s22 = int_to_ptr.vmem [resolvable:$true] %s131_s22 }
   0xe   : > { %s1157_s24 = sadd.s32 1, %s1069_s15   ;;  %s27_s25 = sadd.s32 1, %s1065_s14 }
   0xf   : > { %s1328_s20 = scalar_select %p1141_p8, 1, 0 }
  0x10   : > { %p884_p9 = pneg %p1141_p8  ;;  %s24_s26 = ssub.s32 %s1069_s15, %s1157_s24 }
  0x11   : > { %s941_s29 = scalar_lea.hbm %s1320_s1, 192 }
  0x12   : > { %p1152_p11 = pnand %p884_p9, %p1323_p1  ;;  %p942_p12 = scmp.ne.s32.totalorder %s1320_s1, %s941_s29 }
  0x13   : > { %p948_p5 = scmp.lt.u32.totalorder %s941_s29, %s1320_s1 }
  0x14   : > { %p943_p13 = pneg %p1152_p11 }
  0x16   : > { %p944_p0 = pnand %p943_p13, %p942_p12 }
  0x18   : > { %p945_p3 = pneg %p944_p0 }
  0x1a   : > { %p950_p7 = pnand %p948_p5, %p945_p3 }
  0x1c   : > { %953 = shalt.err (!%p950_p7)
}
  0x1d   : > { %s954_s7 = scalar_lea.vmem %s1145_s22, 192  ;;  %p962_p2 = scmp.lt.s32.totalorder %s1145_s22, %s1145_s22 }
  0x1e   : > { %p955_p9 = scmp.ne.s32.totalorder %s1145_s22, %s954_s7  ;;  %p963_p6 = scmp.lt.s32.totalorder %s954_s7, %s954_s7 }
  0x20   : > { %p957_p10 = pnand %p955_p9, %p943_p13  ;;  %p964_p4 = por %p963_p6, %p962_p2 }
  0x22   : > { %p958_p1 = pneg %p957_p10 }
  0x24   : > { %p965_p8 = pnand %p964_p4, %p958_p1 }
  0x26   : > { %968 = shalt.err (!%p965_p8)
}
  0x27   : > { %s1072_s8 = smov 64   ;;  %s1073_s9 = smov 4  }
  0x28   : > { %887 = dma.hbm_to_vmem [thread:$0]  (!%p1152_p11), %s1320_s1, 192, %s1145_s22, [#allocation6], %s1072_s8, %s1072_s8, %s1073_s9  }
  0x29   : > { %p25_p2 = scmp.eq.s32.totalorder %s24_s26, 0  ;;  %p34_p1 = scmp.ne.s32.totalorder %s1065_s14, %s1061_s13 }
  0x2a   : > { %p35_p4 = scmp.eq.s32.totalorder %s1069_s15, 0  ;;  %p897_p6 = scmp.lt.s32.totalorder %s1069_s15, 2 }
  0x2b   : > { %s1188_s17 = scalar_select %p25_p2, %s1065_s14, %s27_s25  }
  0x2c   : > { %p36_p8 = por %p35_p4, %p34_p1  ;;  %p1330_p10 = scmp.eq.s32.totalorder %s1122_s16, 1 }
  0x2d   : > { %s148_s27 = sand.u32 1, %s1065_s14   ;;  %s786_s28 = sshll.u32 %s1069_s15, 6 }
  0x2e   : > { %p1192_p12 = por %p1330_p10, %p34_p1  ;;  %s785_s29 = sshll.u32 %s148_s27, 2 }
  0x2f   : > { %s1201_s4 = scalar_lea.hbm %s1319_s0, %s786_s28  ;;  %s152_s22 = scalar_lea.vmem [#allocation2], %s785_s29 }
  0x30   : > { %s159_s25 = sshll.u32 %s152_s22, 4  ;;  %p1203_p11 = pnand %p897_p6, %p36_p8  ;;  %s1207_s25 = int_to_ptr.vmem [resolvable:$true] %s159_s25 }
  0x31   : > { %s149_s5 = scalar_lea.sflag [#allocation3], %s148_s27  ;;  %s969_s6 = scalar_lea.hbm %s1201_s4, 64 }
  0x32   : > { %p970_p13 = scmp.ne.s32.totalorder %s1201_s4, %s969_s6  ;;  %p971_p0 = pneg %p1203_p11 }
  0x33   : > { %s974_s9 = scalar_lea.hbm %s1319_s0, 128  ;;  %p975_p7 = scmp.lt.u32.totalorder %s1201_s4, %s1319_s0 }
  0x34   : > { %p972_p3 = pnand %p971_p0, %p970_p13  ;;  %p976_p9 = scmp.lt.u32.totalorder %s974_s9, %s969_s6 }
  0x35   : > { %p978_p1 = scmp.lt.u32.totalorder %s969_s6, %s1201_s4 }
  0x36   : > { %p973_p5 = pneg %p972_p3  ;;  %p977_p2 = por %p976_p9, %p975_p7 }
  0x38   : > { %p979_p4 = por %p978_p1, %p977_p2 }
  0x3a   : > { %p980_p6 = pnand %p979_p4, %p973_p5 }
  0x3c   : > { %983 = shalt.err (!%p980_p6)
}
  0x3d   : > { %s984_s27 = scalar_lea.vmem %s1207_s25, 64  ;;  %s1074_s28 = smov [#allocation2]  }
  0x3e   : > { %p985_p8 = scmp.ne.s32.totalorder %s1207_s25, %s984_s27  ;;  %s989_s29 = sshll.u32 %s1074_s28, 4  ;;  %s990_s29 = int_to_ptr.vmem [resolvable:$false] %s989_s29 }
  0x3f   : > { %s991_s23 = scalar_lea.vmem %s990_s29, 128  ;;  %p992_p3 = scmp.lt.s32.totalorder %s1207_s25, %s990_s29 }
  0x40   : > { %p987_p10 = pnand %p985_p8, %p971_p0  ;;  %p993_p7 = scmp.lt.s32.totalorder %s991_s23, %s984_s27 }
  0x42   : > { %p988_p13 = pneg %p987_p10  ;;  %p994_p9 = por %p993_p7, %p992_p3 }
  0x44   : > { %p995_p2 = pnand %p994_p9, %p988_p13 }
  0x46   : > { %998 = shalt.err (!%p995_p2)
}
  0x47   : > { %891 = dma.hbm_to_vmem [thread:$0]  (!%p1203_p11), %s1201_s4, 64, %s1207_s25, %s149_s5  }
  0x48   : > { %p1333_p5 = scmp.ne.s32.totalorder %s1328_s20, 0 }
  0x49   : > { %s1237_s30 = sand.u32 (!%p1333_p5), 1, %s1061_s13   ;;  %p1334_p0 = scmp.ne.s32.totalorder (!%p1333_p5), %s1326_s18, 0 }
  0x4a   : > { %168 = sbr.rel (%p1333_p5) target bundleno = 758 (0x2f6), region = 32  ;;  %s788_s22 = sshll.u32 (!%p1333_p5), %s1237_s30, 2 }
  0x4b   : > { %s171_s6 = scalar_lea.sflag (!%p1333_p5), [#allocation3], %s1237_s30  ;;  %s174_s7 = scalar_lea.vmem (!%p1333_p5), [#allocation2], %s788_s22 }
  0x51   : > { %1044 = dma.done.wait (%p1334_p0), %s171_s6, 64  }
  0x52   : > { %1046 = vsyncadd (%p1334_p0), %s171_s6, 4294967232  ;;  %p1335_p11 = scmp.eq.s32.totalorder %s1122_s16, 0 }
  0x54   : > { %1048 = dma.done.wait (%p1335_p11), [#allocation6], 192   ;;  %p1336_p1 = pmov %p1335_p11 }
  0x55   : > { %v202_v0 = vlaneseq  ;;  %v1075_v1 = vmov 0.0|0.0   ;;  %vm1076_vm0 = vmmov 0   ;;  %v1077_v4 = vmov 0.0   ;;  %v201_v9 = vld [vmem:[%s174_s7] sm:$0xf]  ;;  %s813_s4 = sshll.u32 %s1122_s16, 6 }
  0x56   : > { %1050 = vsyncadd (%p1336_p1), [#allocation6], 4294967104  ;;  %867 = vmatprep.subr.bf16.mxu0 %v1075_v1  ;;  %870 = vmatprep.subr.bf16.mxu1 %v1075_v1  ;;  %v1078_v8 = vmov 1.0|1.0   ;;  %vm214_vm6 = vcmask 130048   ;;  %vm372_vm8 = vcmask 1043456   ;;  %s1275_s9 = scalar_lea.hbm %s1322_s3, %s813_s4 }
  0x57   : > { %v203_v2 = vshrl.u32 %v202_v0, 7  ;;  %v206_v3 = vand.u32 127, %v202_v0  ;;  %835 = vmatprep.mubr.msk.f32.mxu0 %vm1076_vm0, %v1077_v4  ;;  %842 = vmatprep.mubr.msk.f32.mxu1 %vm1076_vm0, %v1077_v4  ;;  %vm368_vm9 = vcmask 31744   ;;  %v288_v11 = vld [vmem:[#allocation5] sm:$0xf]  ;;  %v1079_v18 = vmov 0  }
  0x58   : > { %v367_v13 = vld [vmem:[#allocation5 + $0x4] sm:$0xf]  ;;  %v678_v17 = vld [vmem:[%s1321_s2] sm:$0xf]  ;;  %940 = vset.pattern.permute.xlu0 %v1079_v18  ;;  %v600_v24 = vld [vmem:[#allocation5 + $0x8] sm:$0xf] }
  0x59   : > { %v204_v5 = vadd.s32 8, %v203_v2  ;;  %v207_v6 = vmul.u32 3, %v206_v3  ;;  %681 = vperm.xlu0 %940, %v678_v17   ;;  %s200_s25 = scalar_lea.vmem [#allocation7], %s788_s22  ;;  %vm685_vm13 = vcmask 35840   ;;  %s688_s10 = scalar_lea.sflag [#allocation4], %s1237_s30 }
  0x5a   : > { %s701_s26 = sshll.u32 %s200_s25, 4  ;;  %s1080_s11 = smov [#allocation7]   ;;  %s1277_s26 = int_to_ptr.vmem [resolvable:$true] %s701_s26 }
  0x5b   : > { %vm208_vm1 = vcmp.eq.s32.totalorder %v203_v2, %v207_v6  ;;  %vm209_vm2 = vcmp.eq.s32.totalorder %v204_v5, %v207_v6  ;;  %v289_v7 = vadd.s32 1, %v207_v6  ;;  %v522_v10 = vadd.s32 2, %v207_v6  ;;  %s999_s16 = scalar_lea.vmem %s1277_s26, 64  ;;  %s1003_s27 = sshll.u32 %s1080_s11, 4  ;;  %s1004_s27 = int_to_ptr.vmem [resolvable:$false] %s1003_s27 }
  0x5c   : > { %vm868_vm3 = vmpackc.low %vm209_vm2, %vm208_vm1  ;;  %p1000_p4 = scmp.ne.s32.totalorder %s1277_s26, %s999_s16  ;;  %s1005_s28 = scalar_lea.vmem %s1004_s27, 128 }
  0x5d   : > { %869 = vmatpush3.bf16.msk.msra.mxu0 %vm868_vm3, %v1078_v8  ;;  %vm290_vm4 = vcmp.eq.s32.totalorder %v203_v2, %v289_v7  ;;  %vm291_vm5 = vcmp.eq.s32.totalorder %v204_v5, %v289_v7  ;;  %vm523_vm10 = vcmp.eq.s32.totalorder %v203_v2, %v522_v10  ;;  %vm524_vm11 = vcmp.eq.s32.totalorder %v204_v5, %v522_v10  ;;  %p1006_p10 = scmp.lt.s32.totalorder %s1277_s26, %s1004_s27  ;;  %p1007_p13 = scmp.lt.s32.totalorder %s1005_s28, %s999_s16 }
  0x5e   : > { %vm871_vm7 = vmpackc.low %vm291_vm5, %vm290_vm4  ;;  %845 = vmatprep.subr.mxu0 %v1077_v4  ;;  %p1001_p6 = pnand %p1000_p4, %p1192_p12 }
  0x5f   : > { %872 = vmatpush3.bf16.msk.msra.mxu1 %vm871_vm7, %v1078_v8  ;;  %vm874_vm12 = vmpackc.low %vm524_vm11, %vm523_vm10  ;;  %p1008_p3 = por %p1007_p13, %p1006_p10 }
  0x60   : > { %836 = vmatmul.mubr.msk.f32.vlgmr.msra.gmra.mrb[0].mxu0 %vm214_vm6, %v201_v9  ;;  %850 = vmatprep.subr.mxu1 %v1077_v4  ;;  %p1002_p8 = pneg %p1001_p6 }
  0x61   : > { %847 = vmatprep.mubr.msk.f32.mxu0 %vm1076_vm0, %v1077_v4 }
  0x62   : > { %843 = vmatmul.mubr.msk.f32.vlgmr.msra.gmra.mrb[0].mxu1 %vm214_vm6, %v201_v9  ;;  %p1009_p7 = pnand %p1008_p3, %p1002_p8 }
  0x63   : > { %852 = vmatprep.mubr.msk.f32.mxu1 %vm1076_vm0, %v1077_v4 }
  0xd8   : > { %v682_v28 = vpop.permute.xlu0 %681 }
 0x133   : > { %v284_v12 = vpop.f32.mrb[0].mxu0 }
 0x134   : > { %851 = vmatpush3.msk.msra.mxu1 %vm372_vm8, %v284_v12  ;;  %v837_v14 = vpop.f32.mrb[1].mxu0 }
 0x135   : > { %v362_v15 = vpop.f32.mrb[0].mxu1  ;;  %853 = vmatmul.mubr.msk.f32.vlgmr.msra.gmra.mrb[2].mxu1 %vm368_vm9, %v288_v11  ;;  %862 = vmatprep.subr.mxu1 %v1077_v4 }
 0x136   : > { %v844_v16 = vpop.f32.mrb[1].mxu1  ;;  %846 = vmatpush3.msk.msra.mxu0 %vm372_vm8, %v362_v15  ;;  %864 = vmatprep.mubr.msk.f32.mxu1 %vm1076_vm0, %v1077_v4 }
 0x137   : > { %848 = vmatmul.mubr.msk.f32.vlgmr.msra.gmra.mrb[2].mxu0 %vm368_vm9, %v367_v13  ;;  %873 = vmatprep.subr.bf16.mxu0 %v1075_v1 }
 0x138   : > { %875 = vmatpush3.bf16.msk.msra.mxu0 %vm874_vm12, %v1078_v8  ;;  %859 = vmatprep.mubr.msk.f32.mxu0 %vm1076_vm0, %v1077_v4 }
 0x13b   : > { %860 = vmatmul.mubr.msk.f32.vlgmr.msra.gmra.mrb[4].mxu0 %vm214_vm6, %v201_v9 }
 0x208   : > { %v518_v19 = vpop.f32.mrb[2].mxu1 }
 0x209   : > { %v854_v20 = vpop.f32.mrb[3].mxu1 }
 0x20a   : > { %v442_v21 = vpop.f32.mrb[2].mxu0 }
 0x20b   : > { %v519_v22 = vadd.f32 %v518_v19, %v442_v21  ;;  %v849_v23 = vpop.f32.mrb[3].mxu0 }
 0x20e   : > { %v595_v25 = vpop.f32.mrb[4].mxu0 }
 0x20f   : > { %v861_v26 = vpop.f32.mrb[5].mxu0  ;;  %863 = vmatpush3.msk.msra.mxu1 %vm372_vm8, %v595_v25 }
 0x210   : > { %865 = vmatmul.mubr.msk.f32.vlgmr.msra.gmra.mrb[4].mxu1 %vm368_vm9, %v600_v24 }
 0x2e3   : > { %v673_v27 = vpop.f32.mrb[4].mxu1 }
 0x2e4   : > { %v677_v29 = vadd.f32 %v673_v27, %v519_v22  ;;  %v866_v30 = vpop.f32.mrb[5].mxu1 }
 0x2e6   : > { %v684_v31 = vadd.f32 %v682_v28, %v677_v29 }
 0x2e8   : > { %686 = vst.msk [vmem:[%s200_s25] sm:$0xf] %vm685_vm13, %v684_v31 }
 0x2e9   : > { %1012 = shalt.err (!%p1009_p7)
}
 0x2ea   : > { %s1013_s29 = scalar_lea.hbm %s1275_s9, 64  ;;  %s1017_s22 = scalar_lea.hbm %s1322_s3, 128 }
 0x2eb   : > { %p1014_p9 = scmp.ne.s32.totalorder %s1275_s9, %s1013_s29  ;;  %p1018_p0 = scmp.lt.u32.totalorder %s1275_s9, %s1322_s3 }
 0x2ec   : > { %p1019_p11 = scmp.lt.u32.totalorder %s1017_s22, %s1013_s29  ;;  %p1021_p4 = scmp.lt.u32.totalorder %s1013_s29, %s1275_s9 }
 0x2ed   : > { %p1015_p2 = pnand %p1014_p9, %p1192_p12 }
 0x2ee   : > { %p1020_p1 = por %p1019_p11, %p1018_p0 }
 0x2ef   : > { %p1016_p5 = pneg %p1015_p2 }
 0x2f0   : > { %p1022_p6 = por %p1021_p4, %p1020_p1 }
 0x2f2   : > { %p1023_p8 = pnand %p1022_p6, %p1016_p5 }
 0x2f4   : > { %1026 = shalt.err (!%p1023_p8)
}
 0x2f5   : > { %882 = dma.vmem_to_hbm [thread:$0]  (%p1192_p12), %s1277_s26, 64, %s1275_s9, %s688_s10  }
 0x2f6 PF: > { %s713_s18 = sand.u32 1, %s1057_s12   ;;  %p1337_p10 = scmp.ne.s32.totalorder %s1327_s19, 0 }
 0x2f7   : > { %p1338_p13 = scmp.ge.s32.totalorder %s1069_s15, 2  ;;  %s714_s20 = scalar_lea.sflag [#allocation4], %s713_s18 }
 0x2f9   : > { %p893_p3 = pnand %p1338_p13, %p1337_p10 }
 0x2fb   : > { %1052 = dma.done.wait (!%p893_p3), %s714_s20, 64  }
 0x2fc   : > { %1054 = vsyncadd (!%p893_p3), %s714_s20, 4294967232  ;;  %p17_p7 = scmp.ge.s32.totalorder %s1157_s24, 4   ;;  %s1339_s12 = smov %s1061_s13 }
 0x2fd   : > { %s1340_s13 = smov %s1065_s14  ;;  %s1341_s14 = smov %s1188_s17 }
 0x2fe   : > { %s1342_s15 = smov %s1157_s24  ;;  %19 = sbr.rel (!%p17_p7) target bundleno = 6 (0x6), region = 83 }
 0x305   :  { %719 = vsyncpa [#allocation3], 1 }
 0x306   :  { %721 = vsyncpa [#allocation3 + $0x1], 1 }
 0x307   :  { %722 = vsyncpa [#allocation6], 1 }
 0x308   :  { %723 = vsyncpa [#allocation4], 1 }
 0x309   :  { %725 = vsyncpa [#allocation4 + $0x1], 1 }

</bundles_post_ra>
